<compile_context>
chip_gen: v5e
topology: v5e:2x2
jax: 0.10.0
libtpu: 0.0.40
codegen_flags: <defaults>
</compile_context>

<pallas_src>
import functools

import jax
import jax.numpy as jnp
from jax.experimental import pallas as pl
from jax.experimental.pallas import tpu as pltpu


def _mrloss_kernel(x_ref, on_ref, off_ref, *, n, d, c_total, ct, chunk):
    """Per-tile partial sums for the MR loss.

    x_ref   : (ct, n*n) input tile (ct channels, row-major flattened matrices).
    on_ref  : (8, 128) f32 block := this tile's sum of (diag_elems - 1)^2.
    off_ref : (8, 128) f32 block := this tile's sum of squared off-diag elems.
    """
    i = pl.program_id(0)
    nn = n * n
    f32 = jnp.float32

    lane = jax.lax.broadcasted_iota(jnp.int32, (1, nn), 1)            # (1, nn)

    # ---------------- off-diagonal Frobenius partial -----------------------
    # Per-lane column sums of squares, accumulated slab by slab so no
    # full-tile f32 temporary is ever materialized in VMEM.
    def col_sumsq(num_rows):                      # num_rows is a Python int
        acc = jnp.zeros((1, nn), f32)
        n_full = num_rows // chunk

        def body(j, acc):
            r0 = pl.multiple_of(j * chunk, chunk)
            xc = x_ref[pl.ds(r0, chunk), :].astype(f32)               # (chunk, nn)
            return acc + jnp.sum(xc * xc, axis=0, keepdims=True)

        if n_full > 0:
            acc = jax.lax.fori_loop(0, n_full, body, acc,
                                    unroll=(n_full <= 8))
        tail = num_rows - n_full * chunk
        if tail > 0:
            xc = x_ref[pl.ds(n_full * chunk, tail), :].astype(f32)
            acc = acc + jnp.sum(xc * xc, axis=0, keepdims=True)
        return acc

    def write_off(num_rows):
        colsq = col_sumsq(num_rows)                                    # (1, nn)
        total = jnp.sum(colsq, keepdims=True)                          # (1, 1)
        # Matrix-diagonal elements (r, r) sit at lane r*(n+1).
        diag = jnp.sum(jnp.where(lane % (n + 1) == 0, colsq, 0.0),
                       keepdims=True)                                  # (1, 1)
        off_ref[...] = jnp.broadcast_to(total - diag, (8, 128))

    grid_py = -(-c_total // ct)                  # Python ceil-div
    rem = c_total - (grid_py - 1) * ct           # valid rows on the last tile
    if rem == ct:
        # C divides evenly into tiles: no overhang code emitted at all.
        write_off(ct)
    else:
        last = pl.num_programs(0) - 1

        @pl.when(i != last)
        def _():
            write_off(ct)

        @pl.when(i == last)
        def _():
            write_off(rem)       # statically shorter reduction; garbage never read

    # ---------------- torch.diagonal term ----------------------------------
    # Elements c1[c, c, :] for global channel c < d live in row c at lanes
    # [c*n, c*n + n).  Only the first min(ct, d) rows of a tile can qualify.
    dd = min(ct, d)
    has_diag = i * ct < d

    @pl.when(has_diag)
    def _():
        xd = x_ref[0:dd, :].astype(f32)                                # (dd, nn)
        ch = i * ct + jax.lax.broadcasted_iota(jnp.int32, (dd, 1), 0)  # (dd, 1)
        start = ch * n
        m = (ch < d) & (lane >= start) & (lane < start + n)            # (dd, nn)
        v = jnp.where(m, xd - 1.0, 0.0)                                # NaN-safe
        on_ref[...] = jnp.broadcast_to(jnp.sum(v * v, keepdims=True), (8, 128))

    @pl.when(jnp.logical_not(has_diag))
    def _():
        on_ref[...] = jnp.zeros((8, 128), f32)


def mrloss(x, label=None, *, tile_bytes=4 << 20):
    """Pallas implementation of MRloss.forward((o1, c1), label)."""
    o1, c1 = x                      # o1, label (and beta) are unused by forward
    del o1, label

    C, N, M = c1.shape
    assert N == M, "c1 must contain square matrices per channel"
    d = min(C, N)
    nn = N * N

    # Lane-dense (C, N*N) view.  For a row-major-contiguous (C, N, N) array
    # this collapse of the two minor dims is layout-preserving (no extra HBM
    # relayout pass); if c1 is produced transposed upstream, emit it flattened
    # there instead.
    x2 = c1.reshape(C, nn)

    itemsize = jnp.dtype(c1.dtype).itemsize
    sub = {4: 8, 2: 16, 1: 32}.get(itemsize, 8)   # dtype-native sublane multiple
    row_bytes = nn * itemsize

    tile_bytes = int(min(tile_bytes, 24 << 20))   # keep 2x tile + headroom < 64 MiB
    rows_cap = max(sub, (tile_bytes // max(row_bytes, 1)) // sub * sub)
    if C > rows_cap:
        ct = int(rows_cap)
    elif C * row_bytes > (1 << 20) and C >= 2 * sub:
        # Large-but-single-tile input: split so both v7x TensorCores get a tile.
        ct = int(((-(-C // 2)) + sub - 1) // sub * sub)
    else:
        ct = C
    grid = pl.cdiv(C, ct)

    # Row slab used inside the kernel: caps the f32 intermediate at ~0.5 MiB.
    chunk_cap = max(8, ((512 * 1024) // (nn * 4)) // 8 * 8)
    chunk = int(min(ct, chunk_cap))

    kernel = functools.partial(
        _mrloss_kernel, n=N, d=d, c_total=C, ct=ct, chunk=chunk)

    # 2x tile for the double-buffered native-dtype input + headroom for slab
    # intermediates and the tiny output buffers; capped for v7x's 64 MiB VMEM,
    # floored above v5e's 16 MiB scoped default.
    vmem_limit = int(min(max(2 * ct * row_bytes + (8 << 20), 16 << 20), 64 << 20))

    cost = pl.CostEstimate(
        flops=3 * C * nn,
        transcendentals=0,
        bytes_accessed=C * nn * itemsize + grid * 8 * 128 * 4 * 2,
    )

    on_out, off_out = pl.pallas_call(
        kernel,
        grid=(grid,),
        in_specs=[
            pl.BlockSpec((ct, nn), lambda i: (i, 0)),   # channel tile (pipelined)
        ],
        out_specs=(
            pl.BlockSpec((8, 128), lambda i: (i, 0)),   # per-tile on-diag partial
            pl.BlockSpec((8, 128), lambda i: (i, 0)),   # per-tile off-diag partial
        ),
        out_shape=(
            jax.ShapeDtypeStruct((grid * 8, 128), jnp.float32),
            jax.ShapeDtypeStruct((grid * 8, 128), jnp.float32),
        ),
        compiler_params=pltpu.CompilerParams(
            dimension_semantics=("parallel",),          # v7x: shard tiles over 2 TCs
            vmem_limit_bytes=vmem_limit,
        ),
        cost_estimate=cost,
    )(x2)

    # Final combine over `grid` per-tile scalars in the wrapper.
    on_total = jnp.sum(on_out[::8, 0])
    off_total = jnp.sum(off_out[::8, 0])
    return on_total / jnp.float32(d * N) + jnp.sqrt(off_total)


def _mrloss_ref(c1):
    """Pure-JAX reference mirroring the PyTorch forward, for verification."""
    c1 = c1.astype(jnp.float32)
    C, N, _ = c1.shape
    d = min(C, N)
    diag = jnp.stack([c1[i, i, :] for i in range(d)])        # (d, N)
    on_mean = jnp.mean((diag - 1.0) ** 2)
    off_mask = ~jnp.eye(N, dtype=bool)
    off_vals = jnp.where(off_mask[None, :, :], c1, 0.0)
    off_norm = jnp.sqrt(jnp.sum(off_vals * off_vals))
    return on_mean + off_norm


if __name__ == "__main__":
    key = jax.random.PRNGKey(0)
    k_c1, k_o1, k_lab, k_big = jax.random.split(key, 4)

    # Small shapes consistent with the module: c1 is (C, N, N) per-channel
    # correlation matrices; o1 / label are unused by forward().
    C, N = 4, 16
    c1 = jax.random.normal(k_c1, (C, N, N), dtype=jnp.float32)
    o1 = jax.random.normal(k_o1, (2, 32), dtype=jnp.float32)
    label = jax.random.randint(k_lab, (2,), 0, 4)

    loss = jax.block_until_ready(mrloss((o1, c1), label))
    ref = jax.block_until_ready(_mrloss_ref(c1))
    assert jnp.allclose(loss, ref, rtol=1e-5, atol=1e-5), (loss, ref)

    # Also exercise the multi-tile grid + last-tile-overhang path.
    c1_big = jax.random.normal(k_big, (40, 16, 16), dtype=jnp.float32)
    loss_big = jax.block_until_ready(
        mrloss((o1, c1_big), label, tile_bytes=16 * 1024))
    ref_big = jax.block_until_ready(_mrloss_ref(c1_big))
    assert jnp.allclose(loss_big, ref_big, rtol=1e-5, atol=1e-5), (loss_big, ref_big)

    print("KERNEL_OK")
</pallas_src>

<mosaic_0001>
module attributes {stable_mosaic.version = 11 : i64} {
  func.func @_mrloss_kernel(%arg0: i32, %arg1: memref<4x256xf32, #tpu.memory_space<vmem>>, %arg2: memref<8x128xf32, #tpu.memory_space<vmem>>, %arg3: memref<8x128xf32, #tpu.memory_space<vmem>>) attributes {dimension_semantics = [#tpu.dimension_semantics<parallel>], iteration_bounds = array<i64: 1>, scalar_prefetch = 0 : i64, scratch_operands = 0 : i64, tpu.core_type = #tpu.core_type<tc>, window_params = [{transform_indices = @transform_0, window_bounds = array<i64: 4, 256>}, {transform_indices = @transform_1, window_bounds = array<i64: 8, 128>}, {transform_indices = @transform_2, window_bounds = array<i64: 8, 128>}]} {
    %0 = tpu.iota {dimensions = array<i32: 1>} : vector<1x256xi32>
    %cst = arith.constant 0.000000e+00 : f32
    %1 = vector.broadcast %cst : f32 to vector<1x256xf32>
    %c0_i32 = arith.constant 0 : i32
    %c4_i32 = arith.constant 4 : i32
    %2 = arith.muli %c0_i32, %c4_i32 : i32
    %3 = tpu.assume_multiple %2, 4 : i32
    %4 = arith.index_cast %3 : i32 to index
    %c0 = arith.constant 0 : index
    %5 = vector.load %arg1[%4, %c0] : memref<4x256xf32, #tpu.memory_space<vmem>>, vector<4x256xf32>
    %6 = arith.mulf %5, %5 : vector<4x256xf32>
    %cst_0 = arith.constant dense<0.000000e+00> : vector<256xf32>
    %7 = vector.multi_reduction <add>, %6, %cst_0 [0] : vector<4x256xf32> to vector<256xf32>
    %8 = vector.shape_cast %7 : vector<256xf32> to vector<1x256xf32>
    %9 = arith.addf %1, %8 : vector<1x256xf32>
    %c1_i32 = arith.constant 1 : i32
    %10 = vector.shape_cast %9 : vector<1x256xf32> to vector<1x1x256xf32>
    %cst_1 = arith.constant dense<0.000000e+00> : vector<1xf32>
    %11 = vector.multi_reduction <add>, %10, %cst_1 [1, 2] : vector<1x1x256xf32> to vector<1xf32>
    %12 = vector.shape_cast %11 : vector<1xf32> to vector<1x1x1xf32>
    %13 = vector.extract %12[0, 0, 0] : f32 from vector<1x1x1xf32>
    %14 = vector.broadcast %13 : f32 to vector<1x1xf32>
    %c17_i32 = arith.constant 17 : i32
    %c0_i32_2 = arith.constant 0 : i32
    %15 = arith.cmpi eq, %c17_i32, %c0_i32_2 : i32
    %c1_i32_3 = arith.constant 1 : i32
    %16 = arith.select %15, %c1_i32_3, %c17_i32 : i32
    %17 = vector.broadcast %16 : i32 to vector<1x256xi32>
    %18 = arith.remsi %0, %17 : vector<1x256xi32>
    %c0_i32_4 = arith.constant 0 : i32
    %19 = vector.broadcast %c0_i32_4 : i32 to vector<1x256xi32>
    %20 = arith.cmpi ne, %18, %19 : vector<1x256xi32>
    %c0_i32_5 = arith.constant 0 : i32
    %21 = vector.broadcast %c0_i32_5 : i32 to vector<1x256xi32>
    %22 = arith.cmpi slt, %18, %21 : vector<1x256xi32>
    %c0_i32_6 = arith.constant 0 : i32
    %23 = arith.cmpi slt, %16, %c0_i32_6 : i32
    %24 = vector.broadcast %23 : i1 to vector<1x256xi1>
    %25 = vector.broadcast %24 : vector<1x256xi1> to vector<1x256xi1>
    %26 = arith.xori %22, %25 : vector<1x256xi1>
    %27 = arith.andi %26, %20 : vector<1x256xi1>
    %28 = vector.broadcast %16 : i32 to vector<1x256xi32>
    %29 = arith.addi %18, %28 : vector<1x256xi32>
    %30 = arith.select %27, %29, %18 : vector<1x256xi1>, vector<1x256xi32>
    %c0_i32_7 = arith.constant 0 : i32
    %31 = vector.broadcast %c0_i32_7 : i32 to vector<1x256xi32>
    %32 = arith.cmpi eq, %30, %31 : vector<1x256xi32>
    %cst_8 = arith.constant 0.000000e+00 : f32
    %33 = vector.broadcast %cst_8 : f32 to vector<1x256xf32>
    %34 = arith.select %32, %9, %33 : vector<1x256xi1>, vector<1x256xf32>
    %35 = vector.shape_cast %34 : vector<1x256xf32> to vector<1x1x256xf32>
    %cst_9 = arith.constant dense<0.000000e+00> : vector<1xf32>
    %36 = vector.multi_reduction <add>, %35, %cst_9 [1, 2] : vector<1x1x256xf32> to vector<1xf32>
    %37 = vector.shape_cast %36 : vector<1xf32> to vector<1x1x1xf32>
    %38 = vector.extract %37[0, 0, 0] : f32 from vector<1x1x1xf32>
    %39 = vector.broadcast %38 : f32 to vector<1x1xf32>
    %40 = arith.subf %14, %39 : vector<1x1xf32>
    %41 = vector.shape_cast %40 : vector<1x1xf32> to vector<1x1xf32>
    %42 = vector.broadcast %41 : vector<1x1xf32> to vector<8x128xf32>
    %c0_10 = arith.constant 0 : index
    %c0_11 = arith.constant 0 : index
    %43 = vector.load %arg3[%c0_10, %c0_11] : memref<8x128xf32, #tpu.memory_space<vmem>>, vector<8x128xf32>
    tpu.vector_store %arg3[%c0_10, %c0_11], %42 {strides = array<i32>} : memref<8x128xf32, #tpu.memory_space<vmem>>, vector<8x128xf32>,
    %c4_i32_12 = arith.constant 4 : i32
    %44 = arith.muli %arg0, %c4_i32_12 : i32
    %c4_i32_13 = arith.constant 4 : i32
    %45 = arith.cmpi slt, %44, %c4_i32_13 : i32
    %46 = arith.extui %45 : i1 to i32
    %c0_i32_14 = arith.constant 0 : i32
    %47 = arith.cmpi ne, %46, %c0_i32_14 : i32
    scf.if %47 {
      %c0_16 = arith.constant 0 : index
      %c0_17 = arith.constant 0 : index
      %51 = vector.load %arg1[%c0_16, %c0_17] : memref<4x256xf32, #tpu.memory_space<vmem>>, vector<4x256xf32>
      %c4_i32_18 = arith.constant 4 : i32
      %52 = arith.muli %arg0, %c4_i32_18 : i32
      %53 = tpu.iota {dimensions = array<i32: 0>} : vector<4x1xi32>
      %54 = vector.broadcast %52 : i32 to vector<4x1xi32>
      %55 = arith.addi %54, %53 : vector<4x1xi32>
      %c16_i32 = arith.constant 16 : i32
      %56 = vector.broadcast %c16_i32 : i32 to vector<4x1xi32>
      %57 = arith.muli %55, %56 : vector<4x1xi32>
      %c4_i32_19 = arith.constant 4 : i32
      %58 = vector.broadcast %c4_i32_19 : i32 to vector<4x1xi32>
      %59 = arith.cmpi slt, %55, %58 : vector<4x1xi32>
      %60 = vector.broadcast %0 : vector<1x256xi32> to vector<4x256xi32>
      %61 = vector.broadcast %57 : vector<4x1xi32> to vector<4x256xi32>
      %62 = arith.cmpi sge, %60, %61 : vector<4x256xi32>
      %63 = vector.broadcast %59 : vector<4x1xi1> to vector<4x256xi1>
      %64 = arith.andi %63, %62 : vector<4x256xi1>
      %c16_i32_20 = arith.constant 16 : i32
      %65 = vector.broadcast %c16_i32_20 : i32 to vector<4x1xi32>
      %66 = arith.addi %57, %65 : vector<4x1xi32>
      %67 = vector.broadcast %0 : vector<1x256xi32> to vector<4x256xi32>
      %68 = vector.broadcast %66 : vector<4x1xi32> to vector<4x256xi32>
      %69 = arith.cmpi slt, %67, %68 : vector<4x256xi32>
      %70 = arith.andi %64, %69 : vector<4x256xi1>
      %cst_21 = arith.constant 1.000000e+00 : f32
      %71 = vector.broadcast %cst_21 : f32 to vector<4x256xf32>
      %72 = arith.subf %51, %71 : vector<4x256xf32>
      %cst_22 = arith.constant 0.000000e+00 : f32
      %73 = vector.broadcast %cst_22 : f32 to vector<4x256xf32>
      %74 = arith.select %70, %72, %73 : vector<4x256xi1>, vector<4x256xf32>
      %75 = arith.mulf %74, %74 : vector<4x256xf32>
      %76 = vector.shape_cast %75 : vector<4x256xf32> to vector<1x4x256xf32>
      %cst_23 = arith.constant dense<0.000000e+00> : vector<1xf32>
      %77 = vector.multi_reduction <add>, %76, %cst_23 [1, 2] : vector<1x4x256xf32> to vector<1xf32>
      %78 = vector.shape_cast %77 : vector<1xf32> to vector<1x1x1xf32>
      %79 = vector.extract %78[0, 0, 0] : f32 from vector<1x1x1xf32>
      %80 = vector.broadcast %79 : f32 to vector<1x1xf32>
      %81 = vector.shape_cast %80 : vector<1x1xf32> to vector<1x1xf32>
      %82 = vector.broadcast %81 : vector<1x1xf32> to vector<8x128xf32>
      %c0_24 = arith.constant 0 : index
      %c0_25 = arith.constant 0 : index
      %83 = vector.load %arg2[%c0_24, %c0_25] : memref<8x128xf32, #tpu.memory_space<vmem>>, vector<8x128xf32>
      tpu.vector_store %arg2[%c0_24, %c0_25], %82 {strides = array<i32>} : memref<8x128xf32, #tpu.memory_space<vmem>>, vector<8x128xf32>,
    } else {
    }
    %true = arith.constant true
    %48 = arith.xori %45, %true : i1
    %49 = arith.extui %48 : i1 to i32
    %c0_i32_15 = arith.constant 0 : i32
    %50 = arith.cmpi ne, %49, %c0_i32_15 : i32
    scf.if %50 {
      %cst_16 = arith.constant 0.000000e+00 : f32
      %51 = vector.broadcast %cst_16 : f32 to vector<8x128xf32>
      %c0_17 = arith.constant 0 : index
      %c0_18 = arith.constant 0 : index
      %52 = vector.load %arg2[%c0_17, %c0_18] : memref<8x128xf32, #tpu.memory_space<vmem>>, vector<8x128xf32>
      tpu.vector_store %arg2[%c0_17, %c0_18], %51 {strides = array<i32>} : memref<8x128xf32, #tpu.memory_space<vmem>>, vector<8x128xf32>,
    } else {
    }
    return
  }
  func.func @transform_0(%arg0: i32) -> (i32, i32) {
    %c0_i32 = arith.constant 0 : i32
    %c0_i32_0 = arith.constant 0 : i32
    return %arg0, %c0_i32 : i32, i32
  }
  func.func @transform_1(%arg0: i32) -> (i32, i32) {
    %c0_i32 = arith.constant 0 : i32
    %c0_i32_0 = arith.constant 0 : i32
    return %arg0, %c0_i32 : i32, i32
  }
  func.func @transform_2(%arg0: i32) -> (i32, i32) {
    %c0_i32 = arith.constant 0 : i32
    %c0_i32_0 = arith.constant 0 : i32
    return %arg0, %c0_i32 : i32, i32
  }
}

</mosaic_0001>

<bundles_post_ra>
// kernel: tpu_custom_call.1
= control target key start
LH: loop header
LB: loop body
LE: loop exit
PB: predicated region body
PF: predicated region fallthrough
CT: control target
= control target key end

     0   :  { %8 = vsyncpa [#allocation3], 0  ;;  %s390_s0 = inlined_call_operand.hbm [shape: f32[4,256], index: 0, kind: input, shape index: {}]   ;;  %s391_s1 = inlined_call_operand.hbm [shape: f32[8,128], index: 1, kind: output, shape index: {0}]   ;;  %s392_s2 = inlined_call_operand.hbm [shape: f32[8,128], index: 2, kind: output, shape index: {1}]  }
   0x1   :  { %9 = vsyncpa [#allocation4], 0 }
   0x2   :  { %10 = vsyncpa [#allocation7], 0  ;;  %s16_s11 = sshll.u32 %s390_s0, 4  ;;  %s333_s12 = smov [#allocation2]   ;;  %s17_s11 = int_to_ptr.hbm [resolvable:$true] %s16_s11 }
   0x3   :  { %s18_s13 = sshll.u32 %s333_s12, 4  ;;  %s19_s13 = int_to_ptr.vmem [resolvable:$true] %s18_s13 }
   0x4   :  { %21 = dma.hbm_to_vmem [thread:$0]  %s17_s11, 128, %s19_s13, [#allocation3]  }
   0x5   :  { %327 = dma.done.wait [#allocation3], 128  }
   0x6   :  { %328 = vsyncadd [#allocation3], 4294967168  ;;  %v26_v0 = vlaneseq  ;;  %v32_v6 = vld [vmem:[#allocation2] sm:$0xff]  ;;  %vm40_vm0 = vcmask 1043456   ;;  %v334_v20 = vmov 0   ;;  %vm57_vm14 = vcmask 1040384  }
   0x7   :  { %v33_v11 = vmul.f32 %v32_v6, %v32_v6  ;;  %v244_v28 = vadd.f32 -1.0, %v32_v6  ;;  %s335_s0 = smov [#allocation5]   ;;  %s218_s18 = sshll.u32 %s391_s1, 4  ;;  %s219_s18 = int_to_ptr.hbm [resolvable:$true] %s218_s18 }
   0x8   :  { %v355_v1 = vand.u32 127, %v26_v0  ;;  %v165_v4 = vshrl.u32 %v26_v0, 7  ;;  %s216_s14 = sshll.u32 %s335_s0, 4  ;;  %s336_s19 = smov [#allocation6]   ;;  %s217_s14 = int_to_ptr.vmem [resolvable:$true] %s216_s14 }
   0x9   :  { %35 = vst [vmem:[#allocation1] ss:$2 sm:$0xff] %v33_v11  ;;  %s227_s20 = sshll.u32 %s336_s19, 4  ;;  %s229_s23 = sshll.u32 %s392_s2, 4  ;;  %s228_s20 = int_to_ptr.vmem [resolvable:$true] %s227_s20  ;;  %s230_s23 = int_to_ptr.hbm [resolvable:$true] %s229_s23 }
   0xa   :  { %v358_v2 = vadd.s32 128, %v355_v1  ;;  %v74_v3 = vand.u32 65535, %v355_v1  ;;  %v75_v5 = vshrl.u32 %v355_v1, 16  ;;  %v168_v12 = vmul.u32 16, %v165_v4 }
   0xb   :  { %vm169_vm4 = vcmp.lt.s32.totalorder %v165_v4, 4 }
   0xc   :  { %v77_v7 = vmul.u32 61681, %v74_v3  ;;  %v78_v8 = vmul.u32 61680, %v74_v3  ;;  %v79_v9 = vmul.u32 61681, %v75_v5  ;;  %v103_v10 = vand.u32 65535, %v358_v2 }
   0xd   :  { %v80_v13 = vmul.u32 61680, %v75_v5  ;;  %v104_v16 = vshrl.u32 %v358_v2, 16  ;;  %v176_v25 = vadd.s32 16, %v168_v12  ;;  %vm170_vm5 = vcmp.ge.s32.totalorder %v355_v1, %v168_v12 }
   0xe   :  { %v81_v14 = vshll.u32 %v78_v8, 16  ;;  %v83_v15 = vshll.u32 %v79_v9, 16  ;;  %v106_v17 = vmul.u32 61681, %v103_v10  ;;  %v107_v18 = vmul.u32 61680, %v103_v10  ;;  %vm174_vm9 = vmand %vm169_vm4, %vm170_vm5 }
   0xf   :  { %v108_v22 = vmul.u32 61681, %v104_v16  ;;  %v109_v23 = vmul.u32 61680, %v104_v16  ;;  %v82_v26 = vshrl.u32 %v78_v8, 16  ;;  %v84_v31 = vshrl.u32 %v79_v9, 16 }
  0x10   :  { %vm85_vm1 = vc.u32 %v77_v7, %v81_v14  ;;  %v87_v19 = vadd.s32 %v81_v14, %v77_v7  ;;  %v110_v24 = vshll.u32 %v107_v18, 16  ;;  %v111_v35 = vshrl.u32 %v107_v18, 16  ;;  %v36_v37 = vld.sshfl [vmem:[#allocation1] sm:$0xff pattern:$0x75316420] }
  0x11   :  { %v86_v21 = vsel %vm85_vm1, 1, %v334_v20  ;;  %v112_v30 = vshll.u32 %v108_v22, 16  ;;  %v37_v38 = vld.sshfl [vmem:[#allocation1 + $0x8] sm:$0xff pattern:$0x75316420]  ;;  %vm171_vm6 = vcmp.ge.s32.totalorder %v358_v2, %v168_v12  ;;  %vm177_vm7 = vcmp.lt.s32.totalorder %v355_v1, %v176_v25 }
  0x12   :  { %v88_v27 = vadd.s32 %v86_v21, %v80_v13  ;;  %vm89_vm2 = vc.u32 %v87_v19, %v83_v15  ;;  %vm114_vm3 = vc.u32 %v106_v17, %v110_v24  ;;  %v116_v34 = vadd.s32 %v110_v24, %v106_v17  ;;  %183 = vst [vmem:[#allocation1] ss:$2 sm:$0xff] %v244_v28  ;;  %vm175_vm10 = vmand %vm169_vm4, %vm171_vm6 }
  0x13   :  { %v90_v29 = vsel %vm89_vm2, 1, %v334_v20  ;;  %v115_v33 = vsel %vm114_vm3, 1, %v334_v20  ;;  %v41_v40 = vsel %vm40_vm0, %v36_v37, 0.0  ;;  %v48_v41 = vsel %vm40_vm0, %v37_v38, 0.0  ;;  %vm179_vm12 = vmand %vm174_vm9, %vm177_vm7 }
  0x14   :  { %v92_v32 = vadd.s32 %v90_v29, %v88_v27  ;;  %v117_v36 = vadd.s32 %v115_v33, %v109_v23  ;;  %vm118_vm8 = vc.u32 %v116_v34, %v112_v30  ;;  %v113_v42 = vshrl.u32 %v108_v22, 16 }
  0x15   :  { %v119_v43 = vsel %vm118_vm8, 1, %v334_v20  ;;  %v42_v44 = vrot.slane %v41_v40, 4  ;;  %v49_v45 = vrot.slane %v48_v41, 4  ;;  %vm178_vm11 = vcmp.lt.s32.totalorder %v358_v2, %v176_v25 }
  0x16   :  { %v93_v39 = vadd.s32 %v92_v32, %v82_v26  ;;  %v121_v47 = vadd.s32 %v119_v43, %v117_v36  ;;  %vm180_vm13 = vmand %vm175_vm10, %vm178_vm11 }
  0x17   :  { %v43_v48 = vadd.f32 %v42_v44, %v41_v40  ;;  %v50_v49 = vadd.f32 %v49_v45, %v48_v41 }
  0x18   :  { %v94_v46 = vadd.s32 %v93_v39, %v84_v31  ;;  %v122_v51 = vadd.s32 %v121_v47, %v111_v35 }
  0x19   :  { %v44_v52 = vrot.slane %v43_v48, 2  ;;  %v51_v53 = vrot.slane %v50_v49, 2  ;;  %v184_v58 = vld.sshfl [vmem:[#allocation1] sm:$0xff pattern:$0x75316420] }
  0x1a   :  { %v95_v50 = vshrl.u32 %v94_v46, 4  ;;  %v123_v55 = vadd.s32 %v122_v51, %v113_v42  ;;  %v185_v59 = vld.sshfl [vmem:[#allocation1 + $0x8] sm:$0xff pattern:$0x75316420]  ;;  %v188_v61 = vsel %vm179_vm12, %v184_v58, 0.0 }
  0x1b   :  { %v45_v56 = vadd.f32 %v44_v52, %v43_v48  ;;  %v52_v57 = vadd.f32 %v51_v53, %v50_v49  ;;  %v189_v62 = vsel %vm180_vm13, %v185_v59, 0.0  ;;  %v190_v4 = vmul.f32 %v188_v61, %v188_v61 }
  0x1c   :  { %v96_v54 = vmul.u32 17, %v95_v50  ;;  %v124_v63 = vshrl.u32 %v123_v55, 4  ;;  %v191_v5 = vmul.f32 %v189_v62, %v189_v62 }
  0x1d   :  { %v46_v0 = vrot.slane %v45_v56, 1  ;;  %v53_v3 = vrot.slane %v52_v57, 1  ;;  %v192_v10 = vsel %vm40_vm0, %v190_v4, 0.0 }
  0x1e   :  { %v97_v60 = vsub.s32 %v355_v1, %v96_v54  ;;  %v125_v6 = vmul.u32 17, %v124_v63  ;;  %v193_v11 = vsel %vm40_vm0, %v191_v5, 0.0 }
  0x1f   :  { %v47_v8 = vadd.f32 %v46_v0, %v45_v56  ;;  %v54_v9 = vadd.f32 %v53_v3, %v52_v57  ;;  %v194_v1 = vadd.f32 %v193_v11, %v192_v10 }
  0x20   :  { %vm129_vm15 = vcmp.ne.s32.totalorder %v97_v60, 0  ;;  %vm131_vm1 = vcmp.lt.s32.totalorder %v97_v60, 0  ;;  %v135_v7 = vadd.s32 17, %v97_v60  ;;  %v126_v12 = vsub.s32 %v358_v2, %v125_v6 }
  0x21   :  { %vm133_vm2 = vmand %vm131_vm1, %vm129_vm15  ;;  %v58_v14 = vsel %vm57_vm14, %v47_v8, 0.0  ;;  %v59_v15 = vsel %vm57_vm14, %v54_v9, 0.0  ;;  %195 = vadd.xlane.f32.xlu1 %v194_v1 }
  0x22   :  { %v137_v13 = vsel %vm133_vm2, %v135_v7, %v97_v60  ;;  %v60_v16 = vadd.f32 %v59_v15, %v58_v14  ;;  %vm130_vm4 = vcmp.ne.s32.totalorder %v126_v12, 0  ;;  %vm132_vm5 = vcmp.lt.s32.totalorder %v126_v12, 0 }
  0x23   :  { %vm139_vm3 = vcmp.eq.s32.totalorder %v137_v13, 0  ;;  %v136_v17 = vadd.s32 17, %v126_v12  ;;  %vm134_vm6 = vmand %vm132_vm5, %vm130_vm4 }
  0x24   :  { %v141_v18 = vsel %vm139_vm3, %v47_v8, 0.0  ;;  %61 = vadd.xlane.f32.xlu0 %v60_v16 }
  0x25   :  { %v138_v19 = vsel %vm134_vm6, %v136_v17, %v126_v12  ;;  %v143_v20 = vsel %vm57_vm14, %v141_v18, 0.0 }
  0x26   :  { %vm140_vm0 = vcmp.eq.s32.totalorder %v138_v19, 0 }
  0x27   :  { %v142_v21 = vsel %vm140_vm0, %v54_v9, 0.0 }
  0x28   :  { %v144_v2 = vsel %vm57_vm14, %v142_v21, 0.0 }
  0x29   :  { %v145_v22 = vadd.f32 %v144_v2, %v143_v20 }
  0x2c   :  { %146 = vadd.xlane.f32.xlu0 %v145_v22 }
  0x94   :  { %v196_v23 = vpop.xlane.xlu1 %195 }
  0x95   :  { %v197_v25 = vrot.slane %v196_v23, 4 }
  0x97   :  { %v62_v24 = vpop.xlane.xlu0 %61  ;;  %v198_v28 = vadd.f32 %v197_v25, %v196_v23 }
  0x98   :  { %v63_v26 = vrot.slane %v62_v24, 4 }
  0x99   :  { %v199_v31 = vrot.slane %v198_v28, 2 }
  0x9a   :  { %v64_v27 = vadd.f32 %v63_v26, %v62_v24 }
  0x9b   :  { %v200_v37 = vadd.f32 %v199_v31, %v198_v28 }
  0x9c   :  { %v65_v29 = vrot.slane %v64_v27, 2 }
  0x9d   :  { %v201_v40 = vrot.slane %v200_v37, 1 }
  0x9e   :  { %v66_v30 = vadd.f32 %v65_v29, %v64_v27 }
  0x9f   :  { %v147_v32 = vpop.xlane.xlu0 %146  ;;  %v202_v43 = vadd.f32 %v201_v40, %v200_v37 }
  0xa0   :  { %v148_v33 = vrot.slane %v147_v32, 4  ;;  %v67_v34 = vrot.slane %v66_v30, 1 }
  0xa2   :  { %v149_v35 = vadd.f32 %v148_v33, %v147_v32  ;;  %v68_v36 = vadd.f32 %v67_v34, %v66_v30 }
  0xa4   :  { %v150_v38 = vrot.slane %v149_v35, 2  ;;  %245 = vpush %v68_v36 }
  0xa6   :  { %v151_v39 = vadd.f32 %v150_v38, %v149_v35 }
  0xa8   :  { %v152_v41 = vrot.slane %v151_v39, 1 }
  0xaa   :  { %v153_v42 = vadd.f32 %v152_v41, %v151_v39 }
  0xac   :  { %247 = vpush %v153_v42 }
  0xad   :  { %249 = vpush %v202_v43 }
  0xd5   :  { %s246_s15 = spop %245 }
  0xd6   :  { %v70_v44 = vstv %s246_s15 }
  0xdd   :  { %s248_s24 = spop %247 }
  0xde   :  { %v155_v45 = vstv %s248_s24  ;;  %s250_s25 = spop %249 }
  0xdf   :  { %v156_v46 = vsub.f32 %v70_v44, %v155_v45  ;;  %v204_v47 = vstv %s250_s25 }
  0xe0   :  { %205 = vst [vmem:[#allocation5] sm:$0xff] %v204_v47 }
  0xe1   :  { %157 = vst [vmem:[#allocation6] sm:$0xff] %v156_v46  ;;  %221 = dma.vmem_to_hbm [thread:$0]  %s217_s14, 128, %s219_s18, [#allocation4]  }
  0xe2   :  { %232 = dma.vmem_to_hbm [thread:$0]  %s228_s20, 128, %s230_s23, [#allocation7]  }
  0xe3   :  { %329 = dma.done.wait [#allocation4], 128  }
  0xe4   :  { %330 = vsyncadd [#allocation4], 4294967168 }
  0xe5   :  { %331 = dma.done.wait [#allocation7], 128  }
  0xe6   :  { %332 = vsyncadd [#allocation7], 4294967168 }
  0xe7   :  { %241 = vsyncpa [#allocation3], 1 }
  0xe8   :  { %242 = vsyncpa [#allocation4], 1 }
  0xe9   :  { %243 = vsyncpa [#allocation7], 1 }

</bundles_post_ra>
